<compile_context>
chip_gen: v6e
topology: v6e:2x2x1
jax: 0.10.0
libtpu: 0.0.40
codegen_flags: <defaults>
</compile_context>

<pallas_src>
import jax
import jax.numpy as jnp
from jax.experimental import pallas as pl
from jax.experimental.pallas import tpu as pltpu

IN_F = 120
HID_F = 84
HID_PAD = 128   # hidden dim padded to a full lane width
OUT_F = 10


def _mlp_head_kernel(x_ref, w1_ref, b1_ref, w2_ref, b2_ref, o_ref):
    # h = relu(x @ W1 + b1), hidden dim padded to 128 lanes
    h = jnp.dot(x_ref[...], w1_ref[...], preferred_element_type=jnp.float32)
    h = jnp.maximum(h + b1_ref[...], 0.0)
    # out = h @ W2 + b2
    out = jnp.dot(h, w2_ref[...], preferred_element_type=jnp.float32)
    o_ref[...] = (out + b2_ref[...]).astype(o_ref.dtype)


def _round_up(n, m):
    return ((n + m - 1) // m) * m


def mlp_head(x, w1, b1, w2, b2, *, tb=4096):
    """x: (B, 120) f32; w1: (120, 84); b1: (1, 84); w2: (84, 10); b2: (1, 10)."""
    B = x.shape[0]
    dtype = x.dtype

    # --- weight prep (free: done once, outside the hot loop) -----------------
    # Zero-pad the kernel-internal hidden dim 84 -> 128.
    w1p = jnp.pad(w1, ((0, 0), (0, HID_PAD - HID_F)))
    b1p = jnp.pad(b1, ((0, 0), (0, HID_PAD - HID_F)))
    w2p = jnp.pad(w2, ((0, HID_PAD - HID_F), (0, 0)))

    # --- batch tiling ---------------------------------------------------------
    # Tile must be a multiple of 8 (sublanes); cap it by the (rounded) batch.
    tb = min(tb, _round_up(B, 8))
    tb = _round_up(tb, 8)
    Bp = _round_up(B, tb)                 # pad batch so the grid is exact
    xp = jnp.pad(x, ((0, Bp - B), (0, 0))) if Bp != B else x
    grid = (Bp // tb,)

    cost = pl.CostEstimate(
        flops=2 * Bp * (IN_F * HID_F + HID_F * OUT_F),
        bytes_accessed=Bp * (IN_F + OUT_F) * 4
        + (IN_F * HID_PAD + HID_PAD + HID_PAD * OUT_F + OUT_F) * 4,
        transcendentals=0,
    )

    out = pl.pallas_call(
        _mlp_head_kernel,
        out_shape=jax.ShapeDtypeStruct((Bp, OUT_F), dtype),
        grid=grid,
        in_specs=[
            # Streamed per grid step (double-buffered by the Pallas pipeline).
            pl.BlockSpec((tb, IN_F), lambda i: (i, 0)),
            # Weights/biases: constant block index -> stay resident in VMEM.
            pl.BlockSpec((IN_F, HID_PAD), lambda i: (0, 0)),
            pl.BlockSpec((1, HID_PAD), lambda i: (0, 0)),
            pl.BlockSpec((HID_PAD, OUT_F), lambda i: (0, 0)),
            pl.BlockSpec((1, OUT_F), lambda i: (0, 0)),
        ],
        out_specs=pl.BlockSpec((tb, OUT_F), lambda i: (i, 0)),
        compiler_params=pltpu.CompilerParams(
            dimension_semantics=("parallel",),   # megacore sharding on v7x
            vmem_limit_bytes=64 << 20,           # headroom for large tb on v5e
        ),
        cost_estimate=cost,
    )(xp, w1p, b1p, w2p, b2)

    return out[:B] if Bp != B else out


def init_params(key):
    """Deterministic init mimicking PyTorch nn.Linear default (uniform +/- 1/sqrt(fan_in))."""
    k1, k2, k3, k4 = jax.random.split(key, 4)
    bound1 = 1.0 / jnp.sqrt(jnp.float32(IN_F))
    bound2 = 1.0 / jnp.sqrt(jnp.float32(HID_F))
    w1 = jax.random.uniform(k1, (IN_F, HID_F), jnp.float32, -bound1, bound1)
    b1 = jax.random.uniform(k2, (1, HID_F), jnp.float32, -bound1, bound1)
    w2 = jax.random.uniform(k3, (HID_F, OUT_F), jnp.float32, -bound2, bound2)
    b2 = jax.random.uniform(k4, (1, OUT_F), jnp.float32, -bound2, bound2)
    return w1, b1, w2, b2


def reference(x, w1, b1, w2, b2):
    h = jnp.maximum(x @ w1 + b1, 0.0)
    return h @ w2 + b2


if __name__ == "__main__":
    key = jax.random.PRNGKey(0)
    kx, kp = jax.random.split(key)
    B = 2
    x = jax.random.normal(kx, (B, IN_F), jnp.float32)
    w1, b1, w2, b2 = init_params(kp)

    out = mlp_head(x, w1, b1, w2, b2)
    out = jax.block_until_ready(out)

    ref = reference(x, w1, b1, w2, b2)
    assert out.shape == (B, OUT_F)
    assert jnp.allclose(out, ref, atol=1e-5, rtol=1e-5)

    # Also exercise a multi-tile, non-divisible batch to validate tiling/padding.
    B2 = 100
    x2 = jax.random.normal(kx, (B2, IN_F), jnp.float32)
    out2 = jax.block_until_ready(mlp_head(x2, w1, b1, w2, b2, tb=64))
    assert out2.shape == (B2, OUT_F)
    assert jnp.allclose(out2, reference(x2, w1, b1, w2, b2), atol=1e-5, rtol=1e-5)

    print("KERNEL_OK")
</pallas_src>

<mosaic_0001>
module attributes {stable_mosaic.version = 11 : i64} {
  func.func @_mlp_head_kernel(%arg0: i32, %arg1: memref<8x120xf32, #tpu.memory_space<vmem>>, %arg2: memref<120x128xf32, #tpu.memory_space<vmem>>, %arg3: memref<1x128xf32, #tpu.memory_space<vmem>>, %arg4: memref<128x10xf32, #tpu.memory_space<vmem>>, %arg5: memref<1x10xf32, #tpu.memory_space<vmem>>, %arg6: memref<8x10xf32, #tpu.memory_space<vmem>>) attributes {dimension_semantics = [#tpu.dimension_semantics<parallel>], iteration_bounds = array<i64: 1>, scalar_prefetch = 0 : i64, scratch_operands = 0 : i64, tpu.core_type = #tpu.core_type<tc>, window_params = [{transform_indices = @transform_0, window_bounds = array<i64: 8, 120>}, {pipeline_mode = #tpu.pipeline_mode<synchronous>, transform_indices = @transform_1, window_bounds = array<i64: 120, 128>}, {pipeline_mode = #tpu.pipeline_mode<synchronous>, transform_indices = @transform_2, window_bounds = array<i64: 1, 128>}, {pipeline_mode = #tpu.pipeline_mode<synchronous>, transform_indices = @transform_3, window_bounds = array<i64: 128, 10>}, {pipeline_mode = #tpu.pipeline_mode<synchronous>, transform_indices = @transform_4, window_bounds = array<i64: 1, 10>}, {transform_indices = @transform_5, window_bounds = array<i64: 8, 10>}]} {
    %c0 = arith.constant 0 : index
    %c0_0 = arith.constant 0 : index
    %0 = vector.load %arg1[%c0, %c0_0] : memref<8x120xf32, #tpu.memory_space<vmem>>, vector<8x120xf32>
    %c0_1 = arith.constant 0 : index
    %c0_2 = arith.constant 0 : index
    %1 = vector.load %arg2[%c0_1, %c0_2] : memref<120x128xf32, #tpu.memory_space<vmem>>, vector<120x128xf32>
    %cst = arith.constant dense<0.000000e+00> : vector<8x128xf32>
    %2 = tpu.matmul %0, %1, %cst {dimension_numbers = #tpu.dot_dimension_numbers<[1], [0], [0], [1], [0, 0, 1, 1], [], []>} : vector<8x120xf32>, vector<120x128xf32>, vector<8x128xf32> -> vector<8x128xf32>
    %c0_3 = arith.constant 0 : index
    %c0_4 = arith.constant 0 : index
    %3 = vector.load %arg3[%c0_3, %c0_4] : memref<1x128xf32, #tpu.memory_space<vmem>>, vector<1x128xf32>
    %4 = vector.broadcast %3 : vector<1x128xf32> to vector<8x128xf32>
    %5 = arith.addf %2, %4 : vector<8x128xf32>
    %cst_5 = arith.constant 0.000000e+00 : f32
    %6 = vector.broadcast %cst_5 : f32 to vector<8x128xf32>
    %7 = arith.maximumf %5, %6 : vector<8x128xf32>
    %c0_6 = arith.constant 0 : index
    %c0_7 = arith.constant 0 : index
    %8 = vector.load %arg4[%c0_6, %c0_7] : memref<128x10xf32, #tpu.memory_space<vmem>>, vector<128x10xf32>
    %cst_8 = arith.constant dense<0.000000e+00> : vector<8x10xf32>
    %9 = tpu.matmul %7, %8, %cst_8 {dimension_numbers = #tpu.dot_dimension_numbers<[1], [0], [0], [1], [0, 0, 1, 1], [], []>} : vector<8x128xf32>, vector<128x10xf32>, vector<8x10xf32> -> vector<8x10xf32>
    %c0_9 = arith.constant 0 : index
    %c0_10 = arith.constant 0 : index
    %10 = vector.load %arg5[%c0_9, %c0_10] : memref<1x10xf32, #tpu.memory_space<vmem>>, vector<1x10xf32>
    %11 = vector.broadcast %10 : vector<1x10xf32> to vector<8x10xf32>
    %12 = arith.addf %9, %11 : vector<8x10xf32>
    %c0_11 = arith.constant 0 : index
    %c0_12 = arith.constant 0 : index
    %13 = vector.load %arg6[%c0_11, %c0_12] : memref<8x10xf32, #tpu.memory_space<vmem>>, vector<8x10xf32>
    tpu.vector_store %arg6[%c0_11, %c0_12], %12 {strides = array<i32>} : memref<8x10xf32, #tpu.memory_space<vmem>>, vector<8x10xf32>,
    return
  }
  func.func @transform_0(%arg0: i32) -> (i32, i32) {
    %c0_i32 = arith.constant 0 : i32
    %c0_i32_0 = arith.constant 0 : i32
    return %arg0, %c0_i32 : i32, i32
  }
  func.func @transform_1(%arg0: i32) -> (i32, i32) {
    %c0_i32 = arith.constant 0 : i32
    %c0_i32_0 = arith.constant 0 : i32
    %c0_i32_1 = arith.constant 0 : i32
    return %c0_i32, %c0_i32_0 : i32, i32
  }
  func.func @transform_2(%arg0: i32) -> (i32, i32) {
    %c0_i32 = arith.constant 0 : i32
    %c0_i32_0 = arith.constant 0 : i32
    %c0_i32_1 = arith.constant 0 : i32
    return %c0_i32, %c0_i32_0 : i32, i32
  }
  func.func @transform_3(%arg0: i32) -> (i32, i32) {
    %c0_i32 = arith.constant 0 : i32
    %c0_i32_0 = arith.constant 0 : i32
    %c0_i32_1 = arith.constant 0 : i32
    return %c0_i32, %c0_i32_0 : i32, i32
  }
  func.func @transform_4(%arg0: i32) -> (i32, i32) {
    %c0_i32 = arith.constant 0 : i32
    %c0_i32_0 = arith.constant 0 : i32
    %c0_i32_1 = arith.constant 0 : i32
    return %c0_i32, %c0_i32_0 : i32, i32
  }
  func.func @transform_5(%arg0: i32) -> (i32, i32) {
    %c0_i32 = arith.constant 0 : i32
    %c0_i32_0 = arith.constant 0 : i32
    return %arg0, %c0_i32 : i32, i32
  }
}

</mosaic_0001>

<bundles_post_ra>
// kernel: tpu_custom_call.1
= control target key start
LH: loop header
LB: loop body
LE: loop exit
PB: predicated region body
PF: predicated region fallthrough
CT: control target
= control target key end

     0   :  { %v357_v1 = vmov 0.0   ;;  %vm358_vm0 = vmmov 0   ;;  %s528_s0 = inlined_call_operand.vmem [shape: f32[8,120], index: 0, kind: input, shape index: {}]   ;;  %s529_s1 = inlined_call_operand.vmem [shape: f32[120,128], index: 1, kind: input, shape index: {}]   ;;  %s530_s2 = inlined_call_operand.vmem [shape: f32[1,128], index: 2, kind: input, shape index: {}]   ;;  %s531_s3 = inlined_call_operand.vmem [shape: f32[128,10], index: 3, kind: input, shape index: {}]   ;;  %s532_s4 = inlined_call_operand.vmem [shape: f32[1,10], index: 4, kind: input, shape index: {}]   ;;  %s533_s5 = inlined_call_operand.hbm [shape: f32[8,10], index: 5, kind: output, shape index: {}]  }
   0x1   :  { %v36_v0 = vld [vmem:[%s529_s1 + $0x70] sm:$0xff]  ;;  %264 = vmatprep.subr.mxu0 %v357_v1  ;;  %v35_v2 = vld [vmem:[%s529_s1 + $0x68] sm:$0xff]  ;;  %294 = vmatprep.mubr.msk.f32.mxu0 %vm358_vm0, %v357_v1  ;;  %v34_v3 = vld [vmem:[%s529_s1 + $0x60] sm:$0xff] }
   0x2   :  { %265 = vmatpush3.msra.mxu0 %v36_v0  ;;  %297 = vmatprep.subr.mxu1 %v357_v1  ;;  %v33_v4 = vld [vmem:[%s529_s1 + $0x58] sm:$0xff]  ;;  %v133_v6 = vld [vmem:[%s531_s3 + $0x70] sm:$0xff]  ;;  %v132_v8 = vld [vmem:[%s531_s3 + $0x68] sm:$0xff] }
   0x3   :  { %266 = vmatprep.subr.mxu0 %v357_v1  ;;  %329 = vmatprep.mubr.msk.f32.mxu1 %vm358_vm0, %v357_v1  ;;  %v134_v5 = vld [vmem:[%s531_s3 + $0x78] sm:$0xff]  ;;  %v32_v7 = vld [vmem:[%s529_s1 + $0x50] sm:$0xff]  ;;  %v31_v9 = vld [vmem:[%s529_s1 + $0x48] sm:$0xff] }
   0x4   :  { %267 = vmatpush3.msra.mxu0 %v35_v2  ;;  %298 = vmatpush3.msra.mxu1 %v134_v5  ;;  %v131_v10 = vld [vmem:[%s531_s3 + $0x60] sm:$0xff] }
   0x5   :  { %268 = vmatprep.subr.mxu0 %v357_v1  ;;  %299 = vmatprep.subr.mxu1 %v357_v1 }
   0x6   :  { %269 = vmatpush3.msra.mxu0 %v34_v3  ;;  %300 = vmatpush3.msra.mxu1 %v133_v6 }
   0x7   :  { %270 = vmatprep.subr.mxu0 %v357_v1  ;;  %301 = vmatprep.subr.mxu1 %v357_v1 }
   0x8   :  { %271 = vmatpush3.msra.mxu0 %v33_v4  ;;  %302 = vmatpush3.msra.mxu1 %v132_v8 }
   0x9   :  { %272 = vmatprep.subr.mxu0 %v357_v1 }
   0xa   :  { %273 = vmatpush3.msra.mxu0 %v32_v7 }
   0xb   :  { %10 = vsyncpa [#allocation3], 0  ;;  %274 = vmatprep.subr.mxu0 %v357_v1  ;;  %v30_v11 = vld [vmem:[%s529_s1 + $0x40] sm:$0xff]  ;;  %303 = vmatprep.subr.mxu1 %v357_v1  ;;  %v130_v12 = vld [vmem:[%s531_s3 + $0x58] sm:$0xff]  ;;  %vm44_vm1 = vcmask 982016   ;;  %s359_s9 = smov [#allocation2]  }
   0xc   :  { %275 = vmatpush3.msra.mxu0 %v31_v9  ;;  %304 = vmatpush3.msra.mxu1 %v131_v10  ;;  %v29_v13 = vld [vmem:[%s529_s1 + $0x38] sm:$0xff]  ;;  %v129_v14 = vld [vmem:[%s531_s3 + $0x50] sm:$0xff]  ;;  %v128_v16 = vld [vmem:[%s531_s3 + $0x48] sm:$0xff]  ;;  %s220_s10 = sshll.u32 %s359_s9, 4  ;;  %vm212_vm2 = vcmask 80896   ;;  %s221_s10 = int_to_ptr.vmem [resolvable:$true] %s220_s10 }
   0xd   :  { %276 = vmatprep.subr.mxu0 %v357_v1  ;;  %305 = vmatprep.subr.mxu1 %v357_v1  ;;  %v28_v15 = vld [vmem:[%s529_s1 + $0x30] sm:$0xff]  ;;  %v27_v17 = vld [vmem:[%s529_s1 + $0x28] sm:$0xff]  ;;  %v127_v18 = vld [vmem:[%s531_s3 + $0x40] sm:$0xff]  ;;  %p340_p1 = scmp.lt.s32.totalorder %s221_s10, %s221_s10 }
   0xe   :  { %277 = vmatpush3.msra.mxu0 %v30_v11  ;;  %306 = vmatpush3.msra.mxu1 %v130_v12  ;;  %v26_v19 = vld [vmem:[%s529_s1 + $0x20] sm:$0xff]  ;;  %v126_v20 = vld [vmem:[%s531_s3 + $0x38] sm:$0xff]  ;;  %v125_v22 = vld [vmem:[%s531_s3 + $0x30] sm:$0xff] }
   0xf   :  { %278 = vmatprep.subr.mxu0 %v357_v1  ;;  %307 = vmatprep.subr.mxu1 %v357_v1  ;;  %v25_v21 = vld [vmem:[%s529_s1 + $0x18] sm:$0xff]  ;;  %v24_v23 = vld [vmem:[%s529_s1 + $0x10] sm:$0xff]  ;;  %v124_v24 = vld [vmem:[%s531_s3 + $0x28] sm:$0xff] }
  0x10   :  { %279 = vmatpush3.msra.mxu0 %v29_v13  ;;  %308 = vmatpush3.msra.mxu1 %v129_v14  ;;  %v23_v25 = vld [vmem:[%s529_s1 + $0x8] sm:$0xff]  ;;  %v123_v26 = vld [vmem:[%s531_s3 + $0x20] sm:$0xff]  ;;  %v122_v28 = vld [vmem:[%s531_s3 + $0x18] sm:$0xff] }
  0x11   :  { %280 = vmatprep.subr.mxu0 %v357_v1  ;;  %309 = vmatprep.subr.mxu1 %v357_v1  ;;  %v22_v27 = vld [vmem:[%s529_s1] sm:$0xff]  ;;  %v121_v30 = vld [vmem:[%s531_s3 + $0x10] sm:$0xff]  ;;  %v120_v31 = vld [vmem:[%s531_s3 + $0x8] sm:$0xff] }
  0x12   :  { %281 = vmatpush3.msra.mxu0 %v28_v15  ;;  %310 = vmatpush3.msra.mxu1 %v128_v16  ;;  %v21_v29 = vld [vmem:[%s528_s0] sm:$0xff] }
  0x13   :  { %282 = vmatprep.subr.mxu0 %v357_v1  ;;  %311 = vmatprep.subr.mxu1 %v357_v1  ;;  %v119_v32 = vld [vmem:[%s531_s3] sm:$0xff]  ;;  %s335_s3 = scalar_lea.vmem %s221_s10, 128 }
  0x14   :  { %283 = vmatpush3.msra.mxu0 %v27_v17  ;;  %312 = vmatpush3.msra.mxu1 %v127_v18  ;;  %v228_v33 = vld [vmem:[%s530_s2] ss:$0 sm:$0xff]  ;;  %p336_p0 = scmp.ne.s32.totalorder %s221_s10, %s335_s3  ;;  %p341_p2 = scmp.lt.s32.totalorder %s335_s3, %s335_s3 }
  0x15   :  { %284 = vmatprep.subr.mxu0 %v357_v1  ;;  %313 = vmatprep.subr.mxu1 %v357_v1  ;;  %v230_v38 = vld [vmem:[%s532_s4] ss:$0 sm:$0xff] }
  0x16   :  { %285 = vmatpush3.msra.mxu0 %v26_v19  ;;  %314 = vmatpush3.msra.mxu1 %v126_v20  ;;  %p342_p3 = por %p341_p2, %p340_p1 }
  0x17   :  { %286 = vmatprep.subr.mxu0 %v357_v1  ;;  %315 = vmatprep.subr.mxu1 %v357_v1 }
  0x18   :  { %287 = vmatpush3.msra.mxu0 %v25_v21  ;;  %316 = vmatpush3.msra.mxu1 %v125_v22  ;;  %p343_p4 = pnand %p342_p3, %p336_p0 }
  0x19   :  { %288 = vmatprep.subr.mxu0 %v357_v1  ;;  %317 = vmatprep.subr.mxu1 %v357_v1 }
  0x1a   :  { %289 = vmatpush3.msra.mxu0 %v24_v23  ;;  %318 = vmatpush3.msra.mxu1 %v124_v24 }
  0x1b   :  { %290 = vmatprep.subr.mxu0 %v357_v1  ;;  %319 = vmatprep.subr.mxu1 %v357_v1 }
  0x1c   :  { %291 = vmatpush3.msra.mxu0 %v23_v25  ;;  %320 = vmatpush3.msra.mxu1 %v123_v26 }
  0x1d   :  { %292 = vmatprep.subr.mxu0 %v357_v1  ;;  %321 = vmatprep.subr.mxu1 %v357_v1 }
  0x1e   :  { %293 = vmatpush3.msra.mxu0 %v22_v27  ;;  %322 = vmatpush3.msra.mxu1 %v122_v28 }
  0x1f   :  { %295 = vmatmul.mubr.msk.f32.vlgmr.msra.gmra.mxu0 %vm44_vm1, %v21_v29  ;;  %323 = vmatprep.subr.mxu1 %v357_v1 }
  0x20   :  { %324 = vmatpush3.msra.mxu1 %v121_v30 }
  0x21   :  { %325 = vmatprep.subr.mxu1 %v357_v1 }
  0x22   :  { %326 = vmatpush3.msra.mxu1 %v120_v31 }
  0x23   :  { %327 = vmatprep.subr.mxu1 %v357_v1 }
  0x24   :  { %328 = vmatpush3.msra.mxu1 %v119_v32 }
  0xdf   :  { %v114_v34 = vpop.f32.mrf.mxu0 }
  0xe0   :  { %v115_v35 = vadd.f32 %v228_v33, %v114_v34 }
  0xe1   :  { %v296_v36 = vpop.f32.mrf.mxu0 }
  0xe2   :  { %v118_v37 = vmax.f32 %v115_v35, 0.0 }
  0xe4   :  { %330 = vmatmul.mubr.f32.vlgmr.msra.gmra.mxu1 %v118_v37 }
 0x1a4   :  { %v208_v39 = vpop.f32.mrf.mxu1 }
 0x1a5   :  { %v209_v40 = vadd.f32 %v230_v38, %v208_v39 }
 0x1a6   :  { %v331_v41 = vpop.f32.mrf.mxu1 }
 0x1a7   :  { %213 = vst.msk [vmem:[#allocation2] sm:$0xff] %vm212_vm2, %v209_v40 }
 0x1a8   :  { %346 = shalt.err (!%p343_p4)
}
 0x1a9   :  { %223 = dma.vmem_to_hbm [thread:$0]  %s221_s10, 128, %s533_s5, [#allocation3]  }
 0x1aa   :  { %355 = dma.done.wait [#allocation3], 128  }
 0x1ab   :  { %356 = vsyncadd [#allocation3], 4294967168 }
 0x1ac   :  { %227 = vsyncpa [#allocation3], 1 }

</bundles_post_ra>
